<compile_context>
chip_gen: v7x
topology: tpu7x:2x2x1
jax: 0.10.0
libtpu: 0.0.40
codegen_flags: <defaults>
</compile_context>

<pallas_src>
import functools

import jax
import jax.numpy as jnp
from jax.experimental import pallas as pl
from jax.experimental.pallas import tpu as pltpu


def _round_up(x, m):
    return ((x + m - 1) // m) * m


# ---------------------------------------------------------------------------
# Kernels
# ---------------------------------------------------------------------------
def _features_linear_d1_kernel(x_ref, off_ref, tab_ref, bias_ref, o_ref):
    """output_dim == 1: VPU compares + multiply + XLU sublane reduction.

    x_ref   : [F, tb] int32  field indices for this batch tile (batch on lanes)
    off_ref : [F, 1]  int32  per-field offsets into the flat vocab
    tab_ref : [V, 1]  f32    embedding table column (D == 1)
    bias_ref: [1, 1]  f32
    o_ref   : [1, tb] f32    lane-dense output row
    """
    _, tb = o_ref.shape
    v = tab_ref.shape[0]
    idx = x_ref[...] + off_ref[...]                               # [F, tb]
    viota = jax.lax.broadcasted_iota(jnp.int32, (v, tb), 0)       # [V, tb]
    counts = jnp.zeros((v, tb), jnp.float32)
    for f in range(idx.shape[0]):                                 # F is small & static
        counts = counts + (viota == idx[f:f + 1, :]).astype(jnp.float32)
    row = jnp.sum(counts * tab_ref[...], axis=0, keepdims=True)   # [1, tb]
    o_ref[...] = (row + bias_ref[...]).astype(o_ref.dtype)


def _features_linear_kernel(x_ref, off_ref, tabT_ref, bias_ref, o_ref):
    """General output_dim: one-hot counts + one [D, V] @ [V, tb] MXU matmul.

    tabT_ref : [D, V]  f32   transposed embedding table
    bias_ref : [D, 1]  f32
    o_ref    : [D, tb] f32   lane-dense output (batch on lanes)
    """
    _, tb = o_ref.shape
    v = tabT_ref.shape[1]
    idx = x_ref[...] + off_ref[...]                               # [F, tb]
    viota = jax.lax.broadcasted_iota(jnp.int32, (v, tb), 0)       # [V, tb]
    counts = jnp.zeros((v, tb), jnp.float32)
    for f in range(idx.shape[0]):
        counts = counts + (viota == idx[f:f + 1, :]).astype(jnp.float32)
    out = jnp.dot(tabT_ref[...], counts, preferred_element_type=jnp.float32)
    o_ref[...] = (out + bias_ref[...]).astype(o_ref.dtype)


# ---------------------------------------------------------------------------
# Wrapper
# ---------------------------------------------------------------------------
def features_linear(x, table, bias, offsets, *, block_b=1024):
    """FeaturesLinear forward.

    x       : [B, F] integer field indices (x[:, f] in [0, field_dims[f]))
    table   : [V, D] embedding weight, V = sum(field_dims)
    bias    : [D]
    offsets : [F] int, (0, cumsum(field_dims)[:-1])
    returns : [B, D] float32
    """
    B, F = x.shape
    V, D = table.shape
    x = x.astype(jnp.int32)
    offsets_col = jnp.asarray(offsets, jnp.int32).reshape(F, 1)
    bias_col = jnp.asarray(bias, jnp.float32).reshape(D, 1)

    # Batch tile = lane dimension: multiple of 128, capped so the [V, tb]
    # one-hot working set stays ~<= 12 MiB of VMEM on every chip generation.
    v_sub = _round_up(V, 8)
    tb_cap = max(128, ((12 * 1024 * 1024) // (v_sub * 4)) // 128 * 128)
    tb = min(_round_up(B, 128), min(block_b, tb_cap))
    Bp = _round_up(B, tb)

    # Pure layout plumbing in the wrapper (batch -> lanes inside the kernel).
    x_t = jnp.pad(x, ((0, Bp - B), (0, 0))).T                     # [F, Bp]
    grid = (Bp // tb,)

    if D == 1:
        kernel = _features_linear_d1_kernel
        tab_arg = jnp.asarray(table, jnp.float32)                 # [V, 1]
        tab_spec = pl.BlockSpec((V, 1), lambda i: (0, 0))
    else:
        kernel = _features_linear_kernel
        tab_arg = jnp.asarray(table, jnp.float32).T               # [D, V]
        tab_spec = pl.BlockSpec((D, V), lambda i: (0, 0))

    out = pl.pallas_call(
        kernel,
        out_shape=jax.ShapeDtypeStruct((D, Bp), jnp.float32),
        grid_spec=pltpu.PrefetchScalarGridSpec(
            num_scalar_prefetch=0,
            grid=grid,
            in_specs=[
                pl.BlockSpec((F, tb), lambda i: (0, i)),   # batch tile of indices
                pl.BlockSpec((F, 1), lambda i: (0, 0)),    # offsets   (resident)
                tab_spec,                                  # table     (resident)
                pl.BlockSpec((D, 1), lambda i: (0, 0)),    # bias      (resident)
            ],
            out_specs=pl.BlockSpec((D, tb), lambda i: (0, i)),
        ),
        compiler_params=pltpu.CompilerParams(
            dimension_semantics=("parallel",),        # megacore: shard batch tiles
            vmem_limit_bytes=32 * 1024 * 1024,        # explicit; safe on v5e/v6e/v7x
        ),
    )(x_t, offsets_col, tab_arg, bias_col)

    return out[:, :B].T                                            # [B, D]


def features_linear_ref(x, table, bias, offsets):
    """Pure-JAX reference (matches the PyTorch module)."""
    idx = x.astype(jnp.int32) + jnp.asarray(offsets, jnp.int32)[None, :]
    emb = jnp.take(jnp.asarray(table, jnp.float32), idx, axis=0)   # [B, F, D]
    return jnp.sum(emb, axis=1) + jnp.asarray(bias, jnp.float32)[None, :]


# ---------------------------------------------------------------------------
# Main
# ---------------------------------------------------------------------------
if __name__ == "__main__":
    key = jax.random.PRNGKey(0)

    field_dims = [3, 5, 7, 9]          # vocab = 24
    num_fields = len(field_dims)
    vocab = sum(field_dims)
    batch = 8

    offsets = jnp.concatenate(
        [jnp.zeros((1,), jnp.int32),
         jnp.cumsum(jnp.asarray(field_dims, jnp.int32))[:-1]])

    k_x, k_t1, k_t2 = jax.random.split(key, 3)
    field_keys = jax.random.split(k_x, num_fields)
    x = jnp.concatenate(
        [jax.random.randint(field_keys[f], (batch, 1), 0, field_dims[f], jnp.int32)
         for f in range(num_fields)], axis=1)                      # [B, F]

    # --- output_dim = 1 (module default): VPU + sublane-reduction path --------
    table1 = jax.random.normal(k_t1, (vocab, 1), jnp.float32)      # torch Embedding ~ N(0,1)
    bias1 = jnp.zeros((1,), jnp.float32)                           # torch.zeros((output_dim,))

    fwd1 = jax.jit(functools.partial(features_linear, offsets=offsets))
    out1 = jax.block_until_ready(fwd1(x, table1, bias1))
    ref1 = features_linear_ref(x, table1, bias1, offsets)
    assert out1.shape == (batch, 1), out1.shape
    assert jnp.all(jnp.isfinite(out1))
    assert jnp.allclose(out1, ref1, atol=1e-5, rtol=1e-5)

    # --- output_dim = 3: general ([D, V] @ [V, tb] MXU) path -------------------
    table3 = jax.random.normal(k_t2, (vocab, 3), jnp.float32)
    bias3 = jnp.zeros((3,), jnp.float32)

    fwd3 = jax.jit(functools.partial(features_linear, offsets=offsets))
    out3 = jax.block_until_ready(fwd3(x, table3, bias3))
    ref3 = features_linear_ref(x, table3, bias3, offsets)
    assert out3.shape == (batch, 3), out3.shape
    assert jnp.all(jnp.isfinite(out3))
    assert jnp.allclose(out3, ref3, atol=1e-5, rtol=1e-5)

    print("KERNEL_OK")
</pallas_src>

<mosaic_0001>
module attributes {stable_mosaic.version = 11 : i64} {
  func.func @_features_linear_d1_kernel(%arg0: i32, %arg1: memref<4x128xi32, #tpu.memory_space<vmem>>, %arg2: memref<4x1xi32, #tpu.memory_space<vmem>>, %arg3: memref<24x1xf32, #tpu.memory_space<vmem>>, %arg4: memref<1x1xf32, #tpu.memory_space<vmem>>, %arg5: memref<1x128xf32, #tpu.memory_space<vmem>>) attributes {dimension_semantics = [#tpu.dimension_semantics<parallel>], iteration_bounds = array<i64: 1>, scalar_prefetch = 0 : i64, scratch_operands = 0 : i64, tpu.core_type = #tpu.core_type<tc>, window_params = [{transform_indices = @transform_0, window_bounds = array<i64: 4, 128>}, {pipeline_mode = #tpu.pipeline_mode<synchronous>, transform_indices = @transform_1, window_bounds = array<i64: 4, 1>}, {pipeline_mode = #tpu.pipeline_mode<synchronous>, transform_indices = @transform_2, window_bounds = array<i64: 24, 1>}, {pipeline_mode = #tpu.pipeline_mode<synchronous>, transform_indices = @transform_3, window_bounds = array<i64: 1, 1>}, {transform_indices = @transform_4, window_bounds = array<i64: 1, 128>}]} {
    %c0 = arith.constant 0 : index
    %c0_0 = arith.constant 0 : index
    %0 = vector.load %arg1[%c0, %c0_0] : memref<4x128xi32, #tpu.memory_space<vmem>>, vector<4x128xi32>
    %c0_1 = arith.constant 0 : index
    %c0_2 = arith.constant 0 : index
    %1 = vector.load %arg2[%c0_1, %c0_2] : memref<4x1xi32, #tpu.memory_space<vmem>>, vector<4x1xi32>
    %2 = vector.broadcast %1 : vector<4x1xi32> to vector<4x128xi32>
    %3 = arith.addi %0, %2 : vector<4x128xi32>
    %4 = tpu.iota {dimensions = array<i32: 0>} : vector<24x128xi32>
    %cst = arith.constant 0.000000e+00 : f32
    %5 = vector.broadcast %cst : f32 to vector<24x128xf32>
    %6 = vector.extract_strided_slice %3 {offsets = [0, 0], sizes = [1, 128], strides = [1, 1]} : vector<4x128xi32> to vector<1x128xi32>
    %7 = vector.broadcast %6 : vector<1x128xi32> to vector<24x128xi32>
    %8 = arith.cmpi eq, %4, %7 : vector<24x128xi32>
    %9 = arith.extui %8 : vector<24x128xi1> to vector<24x128xi32>
    %10 = arith.sitofp %9 : vector<24x128xi32> to vector<24x128xf32>
    %11 = arith.addf %5, %10 : vector<24x128xf32>
    %12 = vector.extract_strided_slice %3 {offsets = [1, 0], sizes = [1, 128], strides = [1, 1]} : vector<4x128xi32> to vector<1x128xi32>
    %13 = vector.broadcast %12 : vector<1x128xi32> to vector<24x128xi32>
    %14 = arith.cmpi eq, %4, %13 : vector<24x128xi32>
    %15 = arith.extui %14 : vector<24x128xi1> to vector<24x128xi32>
    %16 = arith.sitofp %15 : vector<24x128xi32> to vector<24x128xf32>
    %17 = arith.addf %11, %16 : vector<24x128xf32>
    %18 = vector.extract_strided_slice %3 {offsets = [2, 0], sizes = [1, 128], strides = [1, 1]} : vector<4x128xi32> to vector<1x128xi32>
    %19 = vector.broadcast %18 : vector<1x128xi32> to vector<24x128xi32>
    %20 = arith.cmpi eq, %4, %19 : vector<24x128xi32>
    %21 = arith.extui %20 : vector<24x128xi1> to vector<24x128xi32>
    %22 = arith.sitofp %21 : vector<24x128xi32> to vector<24x128xf32>
    %23 = arith.addf %17, %22 : vector<24x128xf32>
    %24 = vector.extract_strided_slice %3 {offsets = [3, 0], sizes = [1, 128], strides = [1, 1]} : vector<4x128xi32> to vector<1x128xi32>
    %25 = vector.broadcast %24 : vector<1x128xi32> to vector<24x128xi32>
    %26 = arith.cmpi eq, %4, %25 : vector<24x128xi32>
    %27 = arith.extui %26 : vector<24x128xi1> to vector<24x128xi32>
    %28 = arith.sitofp %27 : vector<24x128xi32> to vector<24x128xf32>
    %29 = arith.addf %23, %28 : vector<24x128xf32>
    %c0_3 = arith.constant 0 : index
    %c0_4 = arith.constant 0 : index
    %30 = vector.load %arg3[%c0_3, %c0_4] : memref<24x1xf32, #tpu.memory_space<vmem>>, vector<24x1xf32>
    %31 = vector.broadcast %30 : vector<24x1xf32> to vector<24x128xf32>
    %32 = arith.mulf %29, %31 : vector<24x128xf32>
    %cst_5 = arith.constant dense<0.000000e+00> : vector<128xf32>
    %33 = vector.multi_reduction <add>, %32, %cst_5 [0] : vector<24x128xf32> to vector<128xf32>
    %34 = vector.shape_cast %33 : vector<128xf32> to vector<1x128xf32>
    %c0_6 = arith.constant 0 : index
    %c0_7 = arith.constant 0 : index
    %35 = vector.load %arg4[%c0_6, %c0_7] : memref<1x1xf32, #tpu.memory_space<vmem>>, vector<1x1xf32>
    %36 = vector.broadcast %35 : vector<1x1xf32> to vector<1x128xf32>
    %37 = arith.addf %34, %36 : vector<1x128xf32>
    %c0_8 = arith.constant 0 : index
    %c0_9 = arith.constant 0 : index
    %38 = vector.load %arg5[%c0_8, %c0_9] : memref<1x128xf32, #tpu.memory_space<vmem>>, vector<1x128xf32>
    tpu.vector_store %arg5[%c0_8, %c0_9], %37 {strides = array<i32>} : memref<1x128xf32, #tpu.memory_space<vmem>>, vector<1x128xf32>,
    return
  }
  func.func @transform_0(%arg0: i32) -> (i32, i32) {
    %c0_i32 = arith.constant 0 : i32
    %c0_i32_0 = arith.constant 0 : i32
    return %c0_i32, %arg0 : i32, i32
  }
  func.func @transform_1(%arg0: i32) -> (i32, i32) {
    %c0_i32 = arith.constant 0 : i32
    %c0_i32_0 = arith.constant 0 : i32
    %c0_i32_1 = arith.constant 0 : i32
    return %c0_i32, %c0_i32_0 : i32, i32
  }
  func.func @transform_2(%arg0: i32) -> (i32, i32) {
    %c0_i32 = arith.constant 0 : i32
    %c0_i32_0 = arith.constant 0 : i32
    %c0_i32_1 = arith.constant 0 : i32
    return %c0_i32, %c0_i32_0 : i32, i32
  }
  func.func @transform_3(%arg0: i32) -> (i32, i32) {
    %c0_i32 = arith.constant 0 : i32
    %c0_i32_0 = arith.constant 0 : i32
    %c0_i32_1 = arith.constant 0 : i32
    return %c0_i32, %c0_i32_0 : i32, i32
  }
  func.func @transform_4(%arg0: i32) -> (i32, i32) {
    %c0_i32 = arith.constant 0 : i32
    %c0_i32_0 = arith.constant 0 : i32
    return %c0_i32, %arg0 : i32, i32
  }
}

</mosaic_0001>

<bundles_post_ra>
// kernel: features_linear.1
= control target key start
LH: loop header
LB: loop body
LE: loop exit
PB: predicated region body
PF: predicated region fallthrough
CT: control target
= control target key end

     0   :  { %v154_v0 = vmov 0   ;;  %v25_v7 = vlaneseq  ;;  %v155_v21 = vmov 0.0   ;;  %s214_s1 = inlined_call_operand.vmem [shape: s32[4,1], index: 1, kind: input, shape index: {}]   ;;  %s215_s2 = inlined_call_operand.vmem [shape: f32[24,1], index: 2, kind: input, shape index: {}]   ;;  %s216_s3 = inlined_call_operand.<no memory space> [shape: f32[1,1], index: 3, kind: input, shape index: {}]   ;;  %s217_s0 = inlined_call_operand.vmem [shape: s32[4,128], index: 0, kind: input, shape index: {}]   ;;  %s218_s4 = inlined_call_operand.vmem [shape: f32[1,128], index: 4, kind: output, shape index: {}]  }
   0x1   :  { %152 = vset.pattern.permute.xlu0 %v154_v0  ;;  %v20_v1 = vld [vmem:[%s214_s1] sm:$0xf]  ;;  %153 = vset.pattern.permute.xlu1 %v154_v0  ;;  %v94_v2 = vld [vmem:[%s215_s2 + $0x8] sm:$0xff]  ;;  %v9_v3 = vstv %s216_s3  ;;  %v95_v5 = vld [vmem:[%s215_s2 + $0x10] sm:$0xff] }
   0x2   :  { %22 = vperm.xlu0 %152, %v20_v1   ;;  %103 = vperm.xlu1 %153, %v94_v2   ;;  %10 = vst [vmem:[#allocation2] sm:$0x1] %v9_v3  ;;  %v93_v4 = vld [vmem:[%s215_s2] sm:$0xff]  ;;  %v196_v8 = vshrl.u32 %v25_v7, 7 }
   0x3   :  { %v19_v9 = vld [vmem:[%s217_s0] sm:$0xf] }
   0x4   :  { %v47_v10 = vsub.s32 1, %v196_v8  ;;  %v63_v11 = vsub.s32 2, %v196_v8  ;;  %v79_v12 = vsub.s32 3, %v196_v8  ;;  %v31_v13 = vsub.s32 0, %v196_v8 }
   0x5   :  { %v27_v16 = vadd.s32 8, %v196_v8  ;;  %v28_v24 = vadd.s32 16, %v196_v8 }
   0x6   :  { %98 = vperm.xlu0 %152, %v93_v4   ;;  %108 = vperm.xlu1 %153, %v95_v5  }
   0x9   :  { %v122_v6 = vld [vmem:[#allocation2] sm:$0x1] }
   0xa   :  { %125 = vperm.xlu0 %152, %v122_v6  }
  0x81   :  { %v23_v14 = vpop.permute.xlu0 %22  ;;  %v104_v34 = vpop.permute.xlu1 %103 }
  0x82   :  { %v24_v15 = vadd.s32 %v23_v14, %v19_v9 }
  0x84   :  { %v48_v17 = vrot.slane %v24_v15, %v47_v10  ;;  %v64_v18 = vrot.slane %v24_v15, %v63_v11  ;;  %v80_v19 = vrot.slane %v24_v15, %v79_v12  ;;  %v32_v20 = vrot.slane %v24_v15, %v31_v13 }
  0x85   :  { %v99_v38 = vpop.permute.xlu0 %98  ;;  %v109_v49 = vpop.permute.xlu1 %108 }
  0x86   :  { %vm33_vm0 = vcmp.eq.s32.totalorder %v196_v8, %v32_v20  ;;  %vm49_vm1 = vcmp.eq.s32.totalorder %v196_v8, %v48_v17  ;;  %vm65_vm2 = vcmp.eq.s32.totalorder %v196_v8, %v64_v18  ;;  %vm81_vm3 = vcmp.eq.s32.totalorder %v196_v8, %v80_v19 }
  0x87   :  { %v138_v22 = vsel %vm33_vm0, 1.0, %v155_v21  ;;  %v141_v23 = vsel %vm49_vm1, 1.0, %v155_v21  ;;  %vm34_vm4 = vcmp.eq.s32.totalorder %v27_v16, %v32_v20  ;;  %vm50_vm5 = vcmp.eq.s32.totalorder %v27_v16, %v48_v17 }
  0x88   :  { %v58_v25 = vadd.f32 %v141_v23, %v138_v22  ;;  %vm66_vm6 = vcmp.eq.s32.totalorder %v27_v16, %v64_v18  ;;  %v144_v26 = vsel %vm65_vm2, 1.0, %v155_v21  ;;  %v139_v27 = vsel %vm34_vm4, 1.0, %v155_v21 }
  0x89   :  { %v142_v28 = vsel %vm50_vm5, 1.0, %v155_v21  ;;  %v147_v30 = vsel %vm81_vm3, 1.0, %v155_v21  ;;  %vm82_vm7 = vcmp.eq.s32.totalorder %v27_v16, %v80_v19  ;;  %v145_v32 = vsel %vm66_vm6, 1.0, %v155_v21  ;;  %v126_v56 = vpop.permute.xlu0 %125 }
  0x8a   :  { %v74_v29 = vadd.f32 %v144_v26, %v58_v25  ;;  %v59_v31 = vadd.f32 %v142_v28, %v139_v27  ;;  %vm35_vm8 = vcmp.eq.s32.totalorder %v28_v24, %v32_v20  ;;  %vm51_vm9 = vcmp.eq.s32.totalorder %v28_v24, %v48_v17 }
  0x8b   :  { %vm67_vm10 = vcmp.eq.s32.totalorder %v28_v24, %v64_v18  ;;  %v140_v36 = vsel %vm35_vm8, 1.0, %v155_v21  ;;  %v143_v37 = vsel %vm51_vm9, 1.0, %v155_v21  ;;  %v148_v39 = vsel %vm82_vm7, 1.0, %v155_v21 }
  0x8c   :  { %v90_v33 = vadd.f32 %v147_v30, %v74_v29  ;;  %v75_v35 = vadd.f32 %v145_v32, %v59_v31  ;;  %v60_v40 = vadd.f32 %v143_v37, %v140_v36  ;;  %vm83_vm11 = vcmp.eq.s32.totalorder %v28_v24, %v80_v19 }
  0x8d   :  { %v146_v43 = vsel %vm67_vm10, 1.0, %v155_v21  ;;  %v149_v46 = vsel %vm83_vm11, 1.0, %v155_v21  ;;  %v131_v58 = vrot.slane %v126_v56, %v31_v13 }
  0x8e   :  { %v111_v41 = vmul.f32 %v99_v38, %v90_v33  ;;  %v91_v42 = vadd.f32 %v148_v39, %v75_v35  ;;  %v76_v44 = vadd.f32 %v146_v43, %v60_v40 }
  0x90   :  { %v112_v45 = vmul.f32 %v104_v34, %v91_v42  ;;  %v92_v47 = vadd.f32 %v149_v46, %v76_v44 }
  0x92   :  { %v114_v48 = vadd.f32 %v112_v45, %v111_v41  ;;  %v113_v50 = vmul.f32 %v109_v49, %v92_v47 }
  0x94   :  { %v115_v51 = vadd.f32 %v114_v48, %v113_v50 }
  0x96   :  { %v116_v52 = vrot.slane %v115_v51, 4 }
  0x98   :  { %v117_v53 = vadd.f32 %v116_v52, %v115_v51 }
  0x9a   :  { %v118_v54 = vrot.slane %v117_v53, 2 }
  0x9c   :  { %v119_v55 = vadd.f32 %v118_v54, %v117_v53 }
  0x9e   :  { %v120_v57 = vrot.slane %v119_v55, 1 }
  0xa0   :  { %v121_v59 = vadd.f32 %v120_v57, %v119_v55 }
  0xa2   :  { %v132_v60 = vadd.f32 %v131_v58, %v121_v59 }
  0xa4   :  { %133 = vst [vmem:[%s218_s4] sm:$0x1] %v132_v60 }

</bundles_post_ra>
